<compile_context>
chip_gen: v7x
topology: tpu7x:2x2x1
jax: 0.10.0
libtpu: 0.0.40
codegen_flags: <defaults>
</compile_context>

<pallas_src>
import functools

import jax
import jax.numpy as jnp
from jax import lax
from jax.experimental import pallas as pl
from jax.experimental.pallas import tpu as pltpu

LN_EPS = 1e-5  # torch.nn.LayerNorm default eps

# -------------------- model dims (small, synthetic) --------------------
B = 2             # batch
S = 8             # sequence length
H = 32            # bert hidden_size
VOCAB = 100
FFN = 64
PROJ1 = 256       # Linear(H, 256)
PROJ2 = 192       # Linear(256, 192) + LayerNorm(192)
CLS1 = 128        # Linear(192, 128)
N_CLASSES = 4     # config['num_classes']
LOGITS_PAD = 128  # lane-dense padded logits width (valid cols = N_CLASSES)
DROPOUT_RATE = 0.1


# ============================ fused Pallas kernel ============================

def fused_head_kernel(lhs_ref,                       # (B, S, H) f32
                      w1_ref, b1_ref,                # (H, 256) bf16, (1, 256) f32
                      w2_ref, b2_ref,                # (256, 192) bf16, (1, 192) f32
                      g_ref, be_ref,                 # (1, 192) f32 LayerNorm affine
                      wc1_ref, bc1_ref,              # (192, 128) bf16, (1, 128) f32
                      wc2_ref, bc2_ref,              # (128, 128) bf16, (1, 128) f32 (cols >= N_CLASSES are zero)
                      proj_ref,                      # out: (B, 192) f32
                      logits_ref):                   # out: (B, 128) f32 (lane-dense, padded)
    # CLS-token slice done in-kernel (no XLA slice feeding the call).
    x = lhs_ref[...]                                  # (B, S, H) f32
    h = x[:, 0, :]                                    # (B, H) f32

    # --- projection head: Linear -> ReLU -> Linear -> LayerNorm -----------
    # MXU in bf16, f32 accumulation; all elementwise math in f32.
    z1 = jnp.dot(h.astype(jnp.bfloat16), w1_ref[...],
                 preferred_element_type=jnp.float32) + b1_ref[...]
    a1 = jnp.maximum(z1, 0.0)
    z2 = jnp.dot(a1.astype(jnp.bfloat16), w2_ref[...],
                 preferred_element_type=jnp.float32) + b2_ref[...]
    mu = jnp.mean(z2, axis=-1, keepdims=True)
    var = jnp.mean((z2 - mu) ** 2, axis=-1, keepdims=True)
    proj = (z2 - mu) * lax.rsqrt(var + LN_EPS) * g_ref[...] + be_ref[...]
    proj_ref[...] = proj

    # --- classifier: Linear -> Dropout -> Linear ---------------------------
    zc = jnp.dot(proj.astype(jnp.bfloat16), wc1_ref[...],
                 preferred_element_type=jnp.float32) + bc1_ref[...]
    # TODO(synk): torch.nn.Dropout is identity at inference; training-mode mask not emitted.
    logits = jnp.dot(zc.astype(jnp.bfloat16), wc2_ref[...],
                     preferred_element_type=jnp.float32) + bc2_ref[...]
    logits_ref[...] = logits


_VMEM = pl.BlockSpec(memory_space=pltpu.MemorySpace.VMEM)


def fused_head_pallas(last_hidden_state, p):
    """One pallas_call: (proj (B,192), logits_padded (B,128))."""
    b = last_hidden_state.shape[0]
    return pl.pallas_call(
        fused_head_kernel,
        out_shape=(jax.ShapeDtypeStruct((b, PROJ2), jnp.float32),
                   jax.ShapeDtypeStruct((b, LOGITS_PAD), jnp.float32)),
        in_specs=[_VMEM] * 11,
        out_specs=(_VMEM, _VMEM),
    )(last_hidden_state,
      p["proj_w1"], p["proj_b1"], p["proj_w2"], p["proj_b2"],
      p["ln_g"], p["ln_b"],
      p["cls_w1"], p["cls_b1"], p["cls_w2p"], p["cls_b2p"])


# ===================== synthetic BERT stand-in (glue) =====================

def _ln(v, g, b):
    mu = jnp.mean(v, -1, keepdims=True)
    var = jnp.mean((v - mu) ** 2, -1, keepdims=True)
    return (v - mu) * lax.rsqrt(var + LN_EPS) * g + b


def synthetic_bert_encoder(p, input_ids, attention_mask):
    # TODO(synk): pretrained AutoModel backbone replaced by a deterministic
    # single-layer transformer encoder stand-in (same output contract:
    # last_hidden_state of shape (B, S, H), attention_mask respected).
    x = p["tok_emb"][input_ids] + p["pos_emb"][None, :, :]
    q = x @ p["wq"]
    k = x @ p["wk"]
    v = x @ p["wv"]
    scores = jnp.einsum("bqd,bkd->bqk", q, k) / jnp.sqrt(jnp.float32(H))
    mask = attention_mask[:, None, :].astype(jnp.float32)
    scores = scores + (1.0 - mask) * -1e9
    attn = jax.nn.softmax(scores, axis=-1)
    ctx = jnp.einsum("bqk,bkd->bqd", attn, v)
    x = _ln(x + ctx @ p["wo"], p["eln1_g"], p["eln1_b"])
    ff = jnp.maximum(x @ p["wff1"] + p["bff1"], 0.0) @ p["wff2"] + p["bff2"]
    x = _ln(x + ff, p["eln2_g"], p["eln2_b"])
    return x  # last_hidden_state


@jax.jit
def model_forward(params, input_ids, attention_mask):
    """Single fused forward: returns (projection (B,192), logits (B,N_CLASSES))."""
    last_hidden_state = synthetic_bert_encoder(params, input_ids, attention_mask)
    proj, logits_pad = fused_head_pallas(last_hidden_state, params)
    return proj, logits_pad[:, :N_CLASSES]


def forward(params, input_ids, attention_mask, use_classifier=False):
    """Mirrors ModelForClassification.forward(input_ids, attention_mask)."""
    proj, logits = model_forward(params, input_ids, attention_mask)
    return logits if use_classifier else proj


# pure-JAX reference (identical bf16-matmul / f32-accumulate math) for checking
def _head_ref(last_hidden_state, p):
    h = last_hidden_state[:, 0]
    z1 = jnp.dot(h.astype(jnp.bfloat16), p["proj_w1"],
                 preferred_element_type=jnp.float32) + p["proj_b1"]
    a1 = jnp.maximum(z1, 0.0)
    z2 = jnp.dot(a1.astype(jnp.bfloat16), p["proj_w2"],
                 preferred_element_type=jnp.float32) + p["proj_b2"]
    mu = jnp.mean(z2, -1, keepdims=True)
    var = jnp.mean((z2 - mu) ** 2, -1, keepdims=True)
    proj = (z2 - mu) * lax.rsqrt(var + LN_EPS) * p["ln_g"] + p["ln_b"]
    zc = jnp.dot(proj.astype(jnp.bfloat16), p["cls_w1"],
                 preferred_element_type=jnp.float32) + p["cls_b1"]
    logits = jnp.dot(zc.astype(jnp.bfloat16), p["cls_w2p"],
                     preferred_element_type=jnp.float32) + p["cls_b2p"]
    return proj, logits[:, :N_CLASSES]


# ========================= deterministic init =========================

def _kaiming_normal(key, fan_in, fan_out):
    # torch.nn.init.kaiming_normal_ (fan_in, gain=sqrt(2)) on (out,in) weight,
    # stored transposed as (in, out).
    return jax.random.normal(key, (fan_in, fan_out), jnp.float32) * (2.0 / fan_in) ** 0.5


def _xavier_normal(key, fan_in, fan_out):
    return jax.random.normal(key, (fan_in, fan_out), jnp.float32) * (2.0 / (fan_in + fan_out)) ** 0.5


def _linear_bias(key, fan_in, n):
    bound = 1.0 / fan_in ** 0.5
    return jax.random.uniform(key, (1, n), jnp.float32, -bound, bound)


def make_params(key):
    ks = jax.random.split(key, 24)
    p = {}
    # synthetic encoder stand-in (plain JAX, f32)
    p["tok_emb"] = jax.random.normal(ks[0], (VOCAB, H), jnp.float32) * 0.02
    p["pos_emb"] = jax.random.normal(ks[1], (S, H), jnp.float32) * 0.02
    for i, name in enumerate(["wq", "wk", "wv", "wo"]):
        p[name] = jax.random.normal(ks[2 + i], (H, H), jnp.float32) * (1.0 / H ** 0.5)
    p["wff1"] = jax.random.normal(ks[6], (H, FFN), jnp.float32) * (1.0 / H ** 0.5)
    p["bff1"] = jnp.zeros((FFN,), jnp.float32)
    p["wff2"] = jax.random.normal(ks[7], (FFN, H), jnp.float32) * (1.0 / FFN ** 0.5)
    p["bff2"] = jnp.zeros((H,), jnp.float32)
    p["eln1_g"] = jnp.ones((H,), jnp.float32)
    p["eln1_b"] = jnp.zeros((H,), jnp.float32)
    p["eln2_g"] = jnp.ones((H,), jnp.float32)
    p["eln2_b"] = jnp.zeros((H,), jnp.float32)

    # projection_head: Linear(H,256) -> ReLU -> Linear(256,192) -> LayerNorm(192)
    # weights kept in bf16 (MXU-native, halves DMA); biases / LN affine in f32.
    p["proj_w1"] = _kaiming_normal(ks[8], H, PROJ1).astype(jnp.bfloat16)
    p["proj_b1"] = _linear_bias(ks[9], H, PROJ1)
    p["proj_w2"] = _kaiming_normal(ks[10], PROJ1, PROJ2).astype(jnp.bfloat16)
    p["proj_b2"] = _linear_bias(ks[11], PROJ1, PROJ2)
    p["ln_g"] = jnp.ones((1, PROJ2), jnp.float32)
    p["ln_b"] = jnp.zeros((1, PROJ2), jnp.float32)

    # classifier: Linear(192,128) -> Dropout -> Linear(128, n_classes)
    p["cls_w1"] = _xavier_normal(ks[12], PROJ2, CLS1).astype(jnp.bfloat16)
    p["cls_b1"] = jnp.zeros((1, CLS1), jnp.float32)
    # final Linear padded to 128 output lanes (extra columns are zero) so the
    # kernel's logits store is unmasked / lane-dense; valid cols sliced outside.
    w2 = _xavier_normal(ks[13], CLS1, N_CLASSES)
    p["cls_w2p"] = jnp.zeros((CLS1, LOGITS_PAD), jnp.float32).at[:, :N_CLASSES].set(w2).astype(jnp.bfloat16)
    p["cls_b2p"] = jnp.zeros((1, LOGITS_PAD), jnp.float32)
    return p


if __name__ == "__main__":
    root = jax.random.PRNGKey(0)
    k_params, k_ids = jax.random.split(root)
    params = make_params(k_params)

    input_ids = jax.random.randint(k_ids, (B, S), 0, VOCAB, dtype=jnp.int32)
    attention_mask = jnp.ones((B, S), jnp.int32).at[1, 6:].set(0)  # padded tail

    # one fused forward -> both module outputs (use_classifier False / True)
    proj, logits = model_forward(params, input_ids, attention_mask)
    jax.block_until_ready((proj, logits))

    assert proj.shape == (B, PROJ2) and proj.dtype == jnp.float32
    assert logits.shape == (B, N_CLASSES) and logits.dtype == jnp.float32

    # torch-like API (selects one of the two fused outputs)
    p_only = forward(params, input_ids, attention_mask, use_classifier=False)
    l_only = forward(params, input_ids, attention_mask, use_classifier=True)
    assert p_only.shape == (B, PROJ2) and l_only.shape == (B, N_CLASSES)

    # correctness check of the fused Pallas head against pure-JAX reference
    lhs = synthetic_bert_encoder(params, input_ids, attention_mask)
    ref_proj, ref_logits = _head_ref(lhs, params)
    assert jnp.allclose(proj, ref_proj, atol=1e-2, rtol=1e-2)
    assert jnp.allclose(logits, ref_logits, atol=1e-2, rtol=1e-2)
    assert jnp.allclose(p_only, ref_proj, atol=1e-2, rtol=1e-2)
    assert jnp.allclose(l_only, ref_logits, atol=1e-2, rtol=1e-2)

    print("KERNEL_OK")
</pallas_src>

<mosaic_0001>
module attributes {stable_mosaic.version = 11 : i64} {
  func.func @fused_head_kernel(%arg0: memref<2x8x32xf32, #tpu.memory_space<vmem>>, %arg1: memref<32x256xbf16, #tpu.memory_space<vmem>>, %arg2: memref<1x256xf32, #tpu.memory_space<vmem>>, %arg3: memref<256x192xbf16, #tpu.memory_space<vmem>>, %arg4: memref<1x192xf32, #tpu.memory_space<vmem>>, %arg5: memref<1x192xf32, #tpu.memory_space<vmem>>, %arg6: memref<1x192xf32, #tpu.memory_space<vmem>>, %arg7: memref<192x128xbf16, #tpu.memory_space<vmem>>, %arg8: memref<1x128xf32, #tpu.memory_space<vmem>>, %arg9: memref<128x128xbf16, #tpu.memory_space<vmem>>, %arg10: memref<1x128xf32, #tpu.memory_space<vmem>>, %arg11: memref<2x192xf32, #tpu.memory_space<vmem>>, %arg12: memref<2x128xf32, #tpu.memory_space<vmem>>) attributes {dimension_semantics = [], scalar_prefetch = 0 : i64, scratch_operands = 0 : i64, tpu.core_type = #tpu.core_type<tc>} {
    %c0 = arith.constant 0 : index
    %c0_0 = arith.constant 0 : index
    %c0_1 = arith.constant 0 : index
    %0 = vector.load %arg0[%c0, %c0_0, %c0_1] : memref<2x8x32xf32, #tpu.memory_space<vmem>>, vector<2x8x32xf32>
    %1 = vector.extract_strided_slice %0 {offsets = [0, 0, 0], sizes = [2, 1, 32], strides = [1, 1, 1]} : vector<2x8x32xf32> to vector<2x1x32xf32>
    %2 = vector.shape_cast %1 : vector<2x1x32xf32> to vector<2x32xf32>
    %3 = arith.truncf %2 : vector<2x32xf32> to vector<2x32xbf16>
    %c0_2 = arith.constant 0 : index
    %c0_3 = arith.constant 0 : index
    %4 = vector.load %arg1[%c0_2, %c0_3] : memref<32x256xbf16, #tpu.memory_space<vmem>>, vector<32x256xbf16>
    %cst = arith.constant dense<0.000000e+00> : vector<2x256xf32>
    %5 = tpu.matmul %3, %4, %cst {dimension_numbers = #tpu.dot_dimension_numbers<[1], [0], [0], [1], [0, 0, 1, 1], [], []>} : vector<2x32xbf16>, vector<32x256xbf16>, vector<2x256xf32> -> vector<2x256xf32>
    %c0_4 = arith.constant 0 : index
    %c0_5 = arith.constant 0 : index
    %6 = vector.load %arg2[%c0_4, %c0_5] : memref<1x256xf32, #tpu.memory_space<vmem>>, vector<1x256xf32>
    %7 = vector.broadcast %6 : vector<1x256xf32> to vector<2x256xf32>
    %8 = arith.addf %5, %7 : vector<2x256xf32>
    %cst_6 = arith.constant 0.000000e+00 : f32
    %9 = vector.broadcast %cst_6 : f32 to vector<2x256xf32>
    %10 = arith.maximumf %8, %9 : vector<2x256xf32>
    %11 = arith.truncf %10 : vector<2x256xf32> to vector<2x256xbf16>
    %c0_7 = arith.constant 0 : index
    %c0_8 = arith.constant 0 : index
    %12 = vector.load %arg3[%c0_7, %c0_8] : memref<256x192xbf16, #tpu.memory_space<vmem>>, vector<256x192xbf16>
    %cst_9 = arith.constant dense<0.000000e+00> : vector<2x192xf32>
    %13 = tpu.matmul %11, %12, %cst_9 {dimension_numbers = #tpu.dot_dimension_numbers<[1], [0], [0], [1], [0, 0, 1, 1], [], []>} : vector<2x256xbf16>, vector<256x192xbf16>, vector<2x192xf32> -> vector<2x192xf32>
    %c0_10 = arith.constant 0 : index
    %c0_11 = arith.constant 0 : index
    %14 = vector.load %arg4[%c0_10, %c0_11] : memref<1x192xf32, #tpu.memory_space<vmem>>, vector<1x192xf32>
    %15 = vector.broadcast %14 : vector<1x192xf32> to vector<2x192xf32>
    %16 = arith.addf %13, %15 : vector<2x192xf32>
    %cst_12 = arith.constant dense<0.000000e+00> : vector<2xf32>
    %17 = vector.multi_reduction <add>, %16, %cst_12 [1] : vector<2x192xf32> to vector<2xf32>
    %18 = vector.shape_cast %17 : vector<2xf32> to vector<2x1xf32>
    %cst_13 = arith.constant 1.920000e+02 : f32
    %19 = vector.broadcast %cst_13 : f32 to vector<2x1xf32>
    %20 = arith.divf %18, %19 : vector<2x1xf32>
    %21 = vector.broadcast %20 : vector<2x1xf32> to vector<2x192xf32>
    %22 = arith.subf %16, %21 : vector<2x192xf32>
    %23 = arith.mulf %22, %22 : vector<2x192xf32>
    %cst_14 = arith.constant dense<0.000000e+00> : vector<2xf32>
    %24 = vector.multi_reduction <add>, %23, %cst_14 [1] : vector<2x192xf32> to vector<2xf32>
    %25 = vector.shape_cast %24 : vector<2xf32> to vector<2x1xf32>
    %cst_15 = arith.constant 1.920000e+02 : f32
    %26 = vector.broadcast %cst_15 : f32 to vector<2x1xf32>
    %27 = arith.divf %25, %26 : vector<2x1xf32>
    %28 = vector.broadcast %20 : vector<2x1xf32> to vector<2x192xf32>
    %29 = arith.subf %16, %28 : vector<2x192xf32>
    %cst_16 = arith.constant 9.99999974E-6 : f32
    %30 = vector.broadcast %cst_16 : f32 to vector<2x1xf32>
    %31 = arith.addf %27, %30 : vector<2x1xf32>
    %32 = math.rsqrt %31 : vector<2x1xf32>
    %33 = vector.broadcast %32 : vector<2x1xf32> to vector<2x192xf32>
    %34 = arith.mulf %29, %33 : vector<2x192xf32>
    %c0_17 = arith.constant 0 : index
    %c0_18 = arith.constant 0 : index
    %35 = vector.load %arg5[%c0_17, %c0_18] : memref<1x192xf32, #tpu.memory_space<vmem>>, vector<1x192xf32>
    %36 = vector.broadcast %35 : vector<1x192xf32> to vector<2x192xf32>
    %37 = arith.mulf %34, %36 : vector<2x192xf32>
    %c0_19 = arith.constant 0 : index
    %c0_20 = arith.constant 0 : index
    %38 = vector.load %arg6[%c0_19, %c0_20] : memref<1x192xf32, #tpu.memory_space<vmem>>, vector<1x192xf32>
    %39 = vector.broadcast %38 : vector<1x192xf32> to vector<2x192xf32>
    %40 = arith.addf %37, %39 : vector<2x192xf32>
    %c0_21 = arith.constant 0 : index
    %c0_22 = arith.constant 0 : index
    %41 = vector.load %arg11[%c0_21, %c0_22] : memref<2x192xf32, #tpu.memory_space<vmem>>, vector<2x192xf32>
    tpu.vector_store %arg11[%c0_21, %c0_22], %40 {strides = array<i32>} : memref<2x192xf32, #tpu.memory_space<vmem>>, vector<2x192xf32>,
    %42 = arith.truncf %40 : vector<2x192xf32> to vector<2x192xbf16>
    %c0_23 = arith.constant 0 : index
    %c0_24 = arith.constant 0 : index
    %43 = vector.load %arg7[%c0_23, %c0_24] : memref<192x128xbf16, #tpu.memory_space<vmem>>, vector<192x128xbf16>
    %cst_25 = arith.constant dense<0.000000e+00> : vector<2x128xf32>
    %44 = tpu.matmul %42, %43, %cst_25 {dimension_numbers = #tpu.dot_dimension_numbers<[1], [0], [0], [1], [0, 0, 1, 1], [], []>} : vector<2x192xbf16>, vector<192x128xbf16>, vector<2x128xf32> -> vector<2x128xf32>
    %c0_26 = arith.constant 0 : index
    %c0_27 = arith.constant 0 : index
    %45 = vector.load %arg8[%c0_26, %c0_27] : memref<1x128xf32, #tpu.memory_space<vmem>>, vector<1x128xf32>
    %46 = vector.broadcast %45 : vector<1x128xf32> to vector<2x128xf32>
    %47 = arith.addf %44, %46 : vector<2x128xf32>
    %48 = arith.truncf %47 : vector<2x128xf32> to vector<2x128xbf16>
    %c0_28 = arith.constant 0 : index
    %c0_29 = arith.constant 0 : index
    %49 = vector.load %arg9[%c0_28, %c0_29] : memref<128x128xbf16, #tpu.memory_space<vmem>>, vector<128x128xbf16>
    %cst_30 = arith.constant dense<0.000000e+00> : vector<2x128xf32>
    %50 = tpu.matmul %48, %49, %cst_30 {dimension_numbers = #tpu.dot_dimension_numbers<[1], [0], [0], [1], [0, 0, 1, 1], [], []>} : vector<2x128xbf16>, vector<128x128xbf16>, vector<2x128xf32> -> vector<2x128xf32>
    %c0_31 = arith.constant 0 : index
    %c0_32 = arith.constant 0 : index
    %51 = vector.load %arg10[%c0_31, %c0_32] : memref<1x128xf32, #tpu.memory_space<vmem>>, vector<1x128xf32>
    %52 = vector.broadcast %51 : vector<1x128xf32> to vector<2x128xf32>
    %53 = arith.addf %50, %52 : vector<2x128xf32>
    %c0_33 = arith.constant 0 : index
    %c0_34 = arith.constant 0 : index
    %54 = vector.load %arg12[%c0_33, %c0_34] : memref<2x128xf32, #tpu.memory_space<vmem>>, vector<2x128xf32>
    tpu.vector_store %arg12[%c0_33, %c0_34], %53 {strides = array<i32>} : memref<2x128xf32, #tpu.memory_space<vmem>>, vector<2x128xf32>,
    return
  }
}

</mosaic_0001>

<bundles_post_ra>
// kernel: model_forward.1
= control target key start
LH: loop header
LB: loop body
LE: loop exit
PB: predicated region body
PF: predicated region fallthrough
CT: control target
= control target key end

     0   :  { %18 = vsyncpa [#allocation3], 0  ;;  %v959_v2 = vmov 0   ;;  %vm68_vm0 = vcmask 1041409   ;;  %vm91_vm1 = vcmask 261120   ;;  %s1281_s0 = inlined_call_operand.vmem [shape: f32[2,8,32], index: 0, kind: input, shape index: {}]   ;;  %s1282_s1 = inlined_call_operand.vmem [shape: bf16[32,256], index: 1, kind: input, shape index: {}]   ;;  %s1283_s2 = inlined_call_operand.vmem [shape: f32[1,256], index: 2, kind: input, shape index: {}]   ;;  %s1284_s3 = inlined_call_operand.vmem [shape: bf16[256,192], index: 3, kind: input, shape index: {}]   ;;  %s1285_s4 = inlined_call_operand.vmem [shape: f32[1,192], index: 4, kind: input, shape index: {}]   ;;  %s1286_s5 = inlined_call_operand.vmem [shape: f32[1,192], index: 5, kind: input, shape index: {}]   ;;  %s1287_s6 = inlined_call_operand.vmem [shape: f32[1,192], index: 6, kind: input, shape index: {}]   ;;  %s1288_s7 = inlined_call_operand.vmem [shape: bf16[192,128], index: 7, kind: input, shape index: {}]   ;;  %s1289_s8 = inlined_call_operand.vmem [shape: f32[1,128], index: 8, kind: input, shape index: {}]   ;;  %s1290_s9 = inlined_call_operand.vmem [shape: bf16[128,128], index: 9, kind: input, shape index: {}]   ;;  %s1291_s10 = inlined_call_operand.vmem [shape: f32[1,128], index: 10, kind: input, shape index: {}]   ;;  %s1292_s11 = inlined_call_operand.hbm [shape: f32[2,192], index: 11, kind: output, shape index: {0}]   ;;  %s1293_s12 = inlined_call_operand.hbm [shape: f32[2,128], index: 12, kind: output, shape index: {1}]  }
   0x1   :  { %v835_v0 = vld [vmem:[%s1282_s1 + $0x4] ss:$8 sps:$4 sm:$0xff]   ;;  %v837_v1 = vld [vmem:[%s1282_s1] ss:$8 sps:$4 sm:$0xff]   ;;  %127 = vmatprep.mubr.bf16.mxu1 %v959_v2  ;;  %559 = vmatprep.subr.bf16.mxu0 %v959_v2  ;;  %v838_v3 = vld [vmem:[%s1282_s1 + $0x14] ss:$8 sps:$4 sm:$0xff]  }
   0x2   :  { %95 = vmatprep.subr.bf16.mxu1 %v835_v0  ;;  %v840_v4 = vld [vmem:[%s1282_s1 + $0x10] ss:$8 sps:$4 sm:$0xff]   ;;  %v43_v5 = vld [vmem:[%s1281_s0] sm:$0xff]  ;;  %v44_v6 = vld [vmem:[%s1281_s0 + $0x8] sm:$0xff] }
   0x3   :  { %96 = vmatpush1.bf16.msra.mxu1 %v837_v1  ;;  %v45_v7 = vpack.c.bf16 %v43_v5, %v43_v5  ;;  %v46_v8 = vpack.c.bf16 %v44_v6, %v44_v6  ;;  %v843_v9 = vld [vmem:[%s1284_s3 + $0x4] ss:$8 sps:$4 sm:$0xff]   ;;  %v841_v14 = vld [vmem:[%s1284_s3] ss:$8 sps:$4 sm:$0xff]   ;;  %v846_v16 = vld [vmem:[%s1284_s3 + $0x14] ss:$8 sps:$4 sm:$0xff]  }
   0x4   :  { %97 = vmatprep.subr.bf16.mxu1 %v838_v3  ;;  %v844_v17 = vld [vmem:[%s1284_s3 + $0x10] ss:$8 sps:$4 sm:$0xff]   ;;  %v849_v18 = vld [vmem:[%s1284_s3 + $0x24] ss:$8 sps:$4 sm:$0xff]   ;;  %v847_v19 = vld [vmem:[%s1284_s3 + $0x20] ss:$8 sps:$4 sm:$0xff]  }
   0x5   :  { %v65_v10 = vunpack.c.l.b16 %v45_v7  ;;  %v66_v11 = vunpack.c.l.b16 %v46_v8  ;;  %v852_v20 = vld [vmem:[%s1284_s3 + $0x34] ss:$8 sps:$4 sm:$0xff]   ;;  %v850_v21 = vld [vmem:[%s1284_s3 + $0x30] ss:$8 sps:$4 sm:$0xff]   ;;  %v855_v22 = vld [vmem:[%s1284_s3 + $0x44] ss:$8 sps:$4 sm:$0xff]  }
   0x6   :  { %v853_v23 = vld [vmem:[%s1284_s3 + $0x40] ss:$8 sps:$4 sm:$0xff]   ;;  %v858_v24 = vld [vmem:[%s1284_s3 + $0x54] ss:$8 sps:$4 sm:$0xff]   ;;  %v856_v25 = vld [vmem:[%s1284_s3 + $0x50] ss:$8 sps:$4 sm:$0xff]  }
   0x7   :  { %98 = vmatpush1.bf16.msra.mxu1 %v840_v4  ;;  %v67_v12 = vrot.slane %v66_v11, 7  ;;  %v861_v26 = vld [vmem:[%s1284_s3 + $0x64] ss:$8 sps:$4 sm:$0xff]   ;;  %v859_v27 = vld [vmem:[%s1284_s3 + $0x60] ss:$8 sps:$4 sm:$0xff]  }
   0x8   :  { %344 = vmatprep.subr.bf16.mxu1 %v843_v9  ;;  %v864_v28 = vld [vmem:[%s1284_s3 + $0x74] ss:$8 sps:$4 sm:$0xff]  }
   0x9   :  { %v69_v13 = vsel %vm68_vm0, %v67_v12, %v65_v10 }
   0xa   :  { %v70_v15 = vpack.c.b16 %v69_v13, %v69_v13 }
   0xc   :  { %744 = vmatmul.mubr.msk.bf16.vlgmr.msra.gmra.mrb[0].mxu1 %vm91_vm1, %v70_v15 }
   0xd   :  { %345 = vmatpush1.bf16.msra.mxu1 %v841_v14 }
   0xe   :  { %346 = vmatprep.subr.bf16.mxu1 %v846_v16 }
  0x11   :  { %347 = vmatpush1.bf16.msra.mxu1 %v844_v17 }
  0x12   :  { %348 = vmatprep.subr.bf16.mxu1 %v849_v18 }
  0x15   :  { %349 = vmatpush1.bf16.msra.mxu1 %v847_v19 }
  0x16   :  { %350 = vmatprep.subr.bf16.mxu1 %v852_v20 }
  0x19   :  { %351 = vmatpush1.bf16.msra.mxu1 %v850_v21 }
  0x1a   :  { %352 = vmatprep.subr.bf16.mxu1 %v855_v22 }
  0x1d   :  { %353 = vmatpush1.bf16.msra.mxu1 %v853_v23 }
  0x1e   :  { %354 = vmatprep.subr.bf16.mxu1 %v858_v24 }
  0x21   :  { %355 = vmatpush1.bf16.msra.mxu1 %v856_v25 }
  0x22   :  { %356 = vmatprep.subr.bf16.mxu1 %v861_v26 }
  0x23   :  { %19 = vsyncpa [#allocation5], 0  ;;  %v862_v29 = vld [vmem:[%s1284_s3 + $0x70] ss:$8 sps:$4 sm:$0xff]   ;;  %v867_v30 = vld [vmem:[%s1284_s3 + $0x84] ss:$8 sps:$4 sm:$0xff]   ;;  %v53_v46 = vlaneseq }
  0x24   :  { %v865_v31 = vld [vmem:[%s1284_s3 + $0x80] ss:$8 sps:$4 sm:$0xff]   ;;  %v870_v32 = vld [vmem:[%s1284_s3 + $0x94] ss:$8 sps:$4 sm:$0xff]   ;;  %v868_v33 = vld [vmem:[%s1284_s3 + $0x90] ss:$8 sps:$4 sm:$0xff]  }
  0x25   :  { %357 = vmatpush1.bf16.msra.mxu1 %v859_v27  ;;  %v873_v34 = vld [vmem:[%s1284_s3 + $0xa4] ss:$8 sps:$4 sm:$0xff]   ;;  %v871_v35 = vld [vmem:[%s1284_s3 + $0xa0] ss:$8 sps:$4 sm:$0xff]   ;;  %v876_v36 = vld [vmem:[%s1284_s3 + $0xb4] ss:$8 sps:$4 sm:$0xff]  }
  0x26   :  { %358 = vmatprep.subr.bf16.mxu1 %v864_v28  ;;  %v874_v37 = vld [vmem:[%s1284_s3 + $0xb0] ss:$8 sps:$4 sm:$0xff]   ;;  %v879_v38 = vld [vmem:[%s1284_s3 + $0xc4] ss:$8 sps:$4 sm:$0xff]   ;;  %v877_v39 = vld [vmem:[%s1284_s3 + $0xc0] ss:$8 sps:$4 sm:$0xff]  }
  0x27   :  { %v882_v40 = vld [vmem:[%s1284_s3 + $0xd4] ss:$8 sps:$4 sm:$0xff]   ;;  %v880_v41 = vld [vmem:[%s1284_s3 + $0xd0] ss:$8 sps:$4 sm:$0xff]   ;;  %v885_v42 = vld [vmem:[%s1284_s3 + $0xe4] ss:$8 sps:$4 sm:$0xff]  }
  0x28   :  { %v883_v43 = vld [vmem:[%s1284_s3 + $0xe0] ss:$8 sps:$4 sm:$0xff]   ;;  %v888_v44 = vld [vmem:[%s1284_s3 + $0xf4] ss:$8 sps:$4 sm:$0xff]   ;;  %v886_v45 = vld [vmem:[%s1284_s3 + $0xf0] ss:$8 sps:$4 sm:$0xff]  }
  0x29   :  { %359 = vmatpush1.bf16.msra.mxu1 %v862_v29  ;;  %v1146_v47 = vshrl.u32 %v53_v46, 7  ;;  %v51_v49 = vld [vmem:[%s1283_s2] sm:$0x3]  ;;  %vm385_vm2 = vcmask 1041408   ;;  %vm387_vm3 = vcmask 517120   ;;  %v890_v13 = vld [vmem:[%s1288_s7 + $0x8] sm:$0xff]  }
  0x2a   :  { %360 = vmatprep.subr.bf16.mxu1 %v867_v30  ;;  %v172_v63 = vld [vmem:[%s1285_s4] sm:$0x3]  ;;  %v891_v14 = vld [vmem:[%s1288_s7 + $0x10] sm:$0xff]   ;;  %v892_v15 = vld [vmem:[%s1288_s7 + $0x18] sm:$0xff]   ;;  %vm447_vm4 = vcmask 519170   ;;  %vm555_vm5 = vcmask 523264  }
  0x2b   :  { %v1149_v48 = vsub.s32 0, %v1146_v47  ;;  %v1155_v50 = vsub.s32 1, %v1146_v47  ;;  %v889_v12 = vld [vmem:[%s1288_s7] sm:$0xff]   ;;  %v894_v17 = vld [vmem:[%s1288_s7 + $0x28] sm:$0xff]   ;;  %v895_v27 = vld [vmem:[%s1288_s7 + $0x30] sm:$0xff]   ;;  %vm962_vm7 = vmmov 0  }
  0x2c   :  { %560 = vmatpush1.bf16.msra.mxu0 %v889_v12  ;;  %v893_v16 = vld [vmem:[%s1288_s7 + $0x20] sm:$0xff]   ;;  %v896_v28 = vld [vmem:[%s1288_s7 + $0x38] sm:$0xff]   ;;  %v898_v30 = vld [vmem:[%s1288_s7 + $0x48] sm:$0xff]   ;;  %s963_s18 = smov [#allocation2]  }
  0x2d   :  { %361 = vmatpush1.bf16.msra.mxu1 %v865_v31  ;;  %v56_v51 = vrot.slane %v51_v49, %v1149_v48  ;;  %v60_v52 = vrot.slane %v51_v49, %v1155_v50  ;;  %v177_v0 = vrot.slane %v172_v63, %v1149_v48  ;;  %v181_v1 = vrot.slane %v172_v63, %v1155_v50  ;;  %v897_v29 = vld [vmem:[%s1288_s7 + $0x40] sm:$0xff]   ;;  %v899_v31 = vld [vmem:[%s1288_s7 + $0x50] sm:$0xff]   ;;  %vm448_vm6 = vmor %vm447_vm4, %vm385_vm2  ;;  %s718_s2 = sshll.u32 %s963_s18, 4  ;;  %s719_s2 = int_to_ptr.vmem [resolvable:$true] %s718_s2 }
  0x2e   :  { %362 = vmatprep.subr.bf16.mxu1 %v870_v32  ;;  %561 = vmatprep.subr.bf16.mxu0 %v959_v2  ;;  %v900_v32 = vld [vmem:[%s1288_s7 + $0x58] sm:$0xff]   ;;  %v907_v63 = vld [vmem:[%s1290_s9 + $0x30] sm:$0xff]   ;;  %s911_s3 = scalar_lea.vmem %s719_s2, 64  ;;  %p916_p1 = scmp.lt.s32.totalorder %s719_s2, %s719_s2 }
  0x2f   :  { %p912_p0 = scmp.ne.s32.totalorder %s719_s2, %s911_s3  ;;  %p917_p2 = scmp.lt.s32.totalorder %s911_s3, %s911_s3 }
  0x30   :  { %562 = vmatpush1.bf16.msra.mxu0 %v890_v13 }
  0x31   :  { %363 = vmatpush1.bf16.msra.mxu1 %v868_v33  ;;  %563 = vmatprep.subr.bf16.mxu0 %v959_v2  ;;  %v960_v33 = vmov 0.0   ;;  %p918_p3 = por %p917_p2, %p916_p1 }
  0x32   :  { %364 = vmatprep.subr.bf16.mxu1 %v873_v34 }
  0x33   :  { %p919_p4 = pnand %p918_p3, %p912_p0 }
  0x34   :  { %564 = vmatpush1.bf16.msra.mxu0 %v891_v14 }
  0x35   :  { %365 = vmatpush1.bf16.msra.mxu1 %v871_v35  ;;  %565 = vmatprep.subr.bf16.mxu0 %v959_v2 }
  0x36   :  { %366 = vmatprep.subr.bf16.mxu1 %v876_v36 }
  0x38   :  { %566 = vmatpush1.bf16.msra.mxu0 %v892_v15 }
  0x39   :  { %367 = vmatpush1.bf16.msra.mxu1 %v874_v37  ;;  %567 = vmatprep.subr.bf16.mxu0 %v959_v2  ;;  %v408_v37 = vld [vmem:[%s1286_s5] sm:$0x3] }
  0x3a   :  { %368 = vmatprep.subr.bf16.mxu1 %v879_v38  ;;  %v422_v38 = vld [vmem:[%s1287_s6] sm:$0x3] }
  0x3c   :  { %568 = vmatpush1.bf16.msra.mxu0 %v893_v16 }
  0x3d   :  { %369 = vmatpush1.bf16.msra.mxu1 %v877_v39  ;;  %569 = vmatprep.subr.bf16.mxu0 %v959_v2  ;;  %v961_v39 = vmov 1983009808  }
  0x3e   :  { %370 = vmatprep.subr.bf16.mxu1 %v882_v40  ;;  %v440_v40 = vunpack.c.l.s4 %v961_v39 }
  0x40   :  { %570 = vmatpush1.bf16.msra.mxu0 %v894_v17  ;;  %v441_v49 = vunpack.c.0.s8 %v440_v40 }
  0x41   :  { %371 = vmatpush1.bf16.msra.mxu1 %v880_v41  ;;  %571 = vmatprep.subr.bf16.mxu0 %v959_v2  ;;  %v413_v41 = vrot.slane %v408_v37, %v1149_v48 }
  0x42   :  { %372 = vmatprep.subr.bf16.mxu1 %v885_v42 }
  0x44   :  { %572 = vmatpush1.bf16.msra.mxu0 %v895_v27 }
  0x45   :  { %373 = vmatpush1.bf16.msra.mxu1 %v883_v43  ;;  %573 = vmatprep.subr.bf16.mxu0 %v959_v2  ;;  %v427_v43 = vrot.slane %v422_v38, %v1149_v48 }
  0x46   :  { %374 = vmatprep.subr.bf16.mxu1 %v888_v44 }
  0x48   :  { %574 = vmatpush1.bf16.msra.mxu0 %v896_v28 }
  0x49   :  { %375 = vmatpush1.bf16.msra.mxu1 %v886_v45  ;;  %575 = vmatprep.subr.bf16.mxu0 %v959_v2  ;;  %v431_v45 = vrot.slane %v422_v38, %v1155_v50 }
  0x4c   :  { %576 = vmatpush1.bf16.msra.mxu0 %v897_v29 }
  0x4d   :  { %577 = vmatprep.subr.bf16.mxu0 %v959_v2 }
  0x50   :  { %578 = vmatpush1.bf16.msra.mxu0 %v898_v30 }
  0x51   :  { %579 = vmatprep.subr.bf16.mxu0 %v959_v2 }
  0x54   :  { %580 = vmatpush1.bf16.msra.mxu0 %v899_v31 }
  0x55   :  { %581 = vmatprep.subr.bf16.mxu0 %v959_v2  ;;  %v417_v2 = vrot.slane %v408_v37, %v1155_v50 }
  0x58   :  { %582 = vmatpush1.bf16.msra.mxu0 %v900_v32 }
  0x59   :  { %809 = vmatprep.subr.bf16.mxu0 %v960_v33 }
  0xdf   :  { %v129_v53 = vpop.f32.mrb[0].mxu1 }
  0xe0   :  { %v130_v54 = vadd.f32 %v129_v53, %v56_v51  ;;  %v131_v55 = vpop.f32.mrb[1].mxu1 }
  0xe1   :  { %v132_v56 = vadd.f32 %v131_v55, %v60_v52  ;;  %v133_v57 = vpop.f32.mrb[2].mxu1  ;;  %v444_v55 = vsub.s32 %v441_v49, %v1146_v47  ;;  %v903_v47 = vld [vmem:[%s1290_s9 + $0x10] sm:$0xff]  }
  0xe2   :  { %v136_v58 = vmax.f32 %v130_v54, 0.0  ;;  %v134_v59 = vpop.f32.mrb[3].mxu1 }
  0xe3   :  { %v137_v60 = vmax.f32 %v132_v56, 0.0  ;;  %v902_v59 = vld [vmem:[%s1290_s9 + $0x8] sm:$0xff]  }
  0xe4   :  { %v138_v62 = vpack.c.bf16 %v136_v58, %v136_v58  ;;  %v901_v58 = vld [vmem:[%s1290_s9] sm:$0xff]  }
  0xe5   :  { %v139_v61 = vpack.c.bf16 %v137_v60, %v137_v60  ;;  %v904_v60 = vld [vmem:[%s1290_s9 + $0x18] sm:$0xff]  }
  0xe7   :  { %376 = vmatprep.mubr.bf16.mxu1 %v139_v61  ;;  %v905_v61 = vld [vmem:[%s1290_s9 + $0x20] sm:$0xff]  }
  0xe8   :  { %377 = vmatmul.mubr.bf16.vlgmr.msra.gmra.mrb[4].mxu1 %v138_v62  ;;  %v906_v62 = vld [vmem:[%s1290_s9 + $0x28] sm:$0xff]  }
 0x1bb   :  { %v378_v3 = vpop.f32.mrb[4].mxu1 }
 0x1bc   :  { %v379_v4 = vadd.f32 %v378_v3, %v177_v0  ;;  %v380_v5 = vpop.f32.mrb[5].mxu1  ;;  %v908_v0 = vld [vmem:[%s1290_s9 + $0x38] sm:$0xff]  }
 0x1bd   :  { %v381_v6 = vadd.f32 %v380_v5, %v181_v1  ;;  %v382_v7 = vpop.f32.mrb[6].mxu1  ;;  %v777_v1 = vld [vmem:[%s1289_s8] ss:$0 sm:$0xff] }
 0x1be   :  { %v383_v8 = vpop.f32.mrb[7].mxu1  ;;  %v386_v9 = vsel %vm385_vm2, %v379_v4, 0.0 }
 0x1bf   :  { %v388_v10 = vsel %vm387_vm3, %v381_v6, 0.0 }
 0x1c0   :  { %v389_v11 = vadd.f32 %v388_v10, %v386_v9 }
 0x1c2   :  { %390 = vadd.xlane.f32.xlu0 %v389_v11 }
 0x24f   :  { %v391_v18 = vpop.xlane.xlu0 %390 }
 0x250   :  { %v393_v19 = vmul.f32 0.0052083335, %v391_v18 }
 0x252   :  { %v394_v20 = vsub.f32 %v379_v4, %v393_v19  ;;  %v395_v21 = vsub.f32 %v381_v6, %v393_v19 }
 0x254   :  { %v396_v22 = vmul.f32 %v394_v20, %v394_v20  ;;  %v397_v23 = vmul.f32 %v395_v21, %v395_v21 }
 0x256   :  { %v398_v24 = vsel %vm385_vm2, %v396_v22, 0.0  ;;  %v399_v25 = vsel %vm387_vm3, %v397_v23, 0.0 }
 0x257   :  { %v400_v26 = vadd.f32 %v399_v25, %v398_v24 }
 0x259   :  { %401 = vadd.xlane.f32.xlu0 %v400_v26 }
 0x2e6   :  { %v402_v34 = vpop.xlane.xlu0 %401 }
 0x2e7   :  { %v403_v35 = vmul.f32 0.0052083335, %v402_v34 }
 0x2e9   :  { %v404_v36 = vadd.f32 1e-05, %v403_v35 }
 0x2eb   :  { %909 = vrsqrt.f32 %v404_v36 }
 0x2f5   :  { %v910_v42 = vpop.eup %909 }
 0x2f6   :  { %v407_v44 = vmul.f32 %v910_v42, %v395_v21  ;;  %v406_v46 = vmul.f32 %v910_v42, %v394_v20 }
 0x2f8   :  { %v421_v51 = vmul.f32 %v417_v2, %v407_v44  ;;  %v420_v52 = vmul.f32 %v413_v41, %v406_v46 }
 0x2fa   :  { %v435_v53 = vadd.f32 %v431_v45, %v421_v51  ;;  %v434_v54 = vadd.f32 %v427_v43, %v420_v52 }
 0x2fc   :  { %v451_v56 = vpack.c.bf16 %v435_v53, %v435_v53  ;;  %v450_v57 = vpack.c.bf16 %v434_v54, %v434_v54  ;;  %v438_v48 = vcombine.low %v434_v54, %v435_v53 }
 0x2fe   :  { %790 = vmatprep.mubr.msk.bf16.mxu0 %vm555_vm5, %v451_v56  ;;  %v445_v50 = vrot.slane %v438_v48, %v444_v55 }
 0x2ff   :  { %592 = vmatmul.mubr.bf16.vlgmr.msra.gmra.mrb[0].mxu0 %v450_v57 }
 0x300   :  { %810 = vmatpush3.bf16.msra.mxu0 %v901_v58  ;;  %449 = vst.msk [vmem:[#allocation2] sm:$0xf] %vm448_vm6, %v445_v50  ;;  %825 = vmatprep.mubr.msk.bf16.mxu0 %vm962_vm7, %v960_v33 }
 0x301   :  { %811 = vmatprep.subr.bf16.mxu0 %v960_v33 }
 0x304   :  { %812 = vmatpush3.bf16.msra.mxu0 %v902_v59 }
 0x305   :  { %813 = vmatprep.subr.bf16.mxu0 %v960_v33 }
 0x308   :  { %814 = vmatpush3.bf16.msra.mxu0 %v903_v47 }
 0x309   :  { %815 = vmatprep.subr.bf16.mxu0 %v960_v33 }
 0x30c   :  { %816 = vmatpush3.bf16.msra.mxu0 %v904_v60 }
 0x30d   :  { %817 = vmatprep.subr.bf16.mxu0 %v960_v33 }
 0x310   :  { %818 = vmatpush3.bf16.msra.mxu0 %v905_v61 }
 0x311   :  { %819 = vmatprep.subr.bf16.mxu0 %v960_v33 }
 0x314   :  { %820 = vmatpush3.bf16.msra.mxu0 %v906_v62 }
 0x315   :  { %821 = vmatprep.subr.bf16.mxu0 %v960_v33 }
 0x318   :  { %822 = vmatpush3.bf16.msra.mxu0 %v907_v63 }
 0x319   :  { %823 = vmatprep.subr.bf16.mxu0 %v960_v33 }
 0x31c   :  { %824 = vmatpush3.bf16.msra.mxu0 %v908_v0 }
 0x3d2   :  { %v593_v3 = vpop.f32.mrb[0].mxu0 }
 0x3d3   :  { %v594_v4 = vadd.f32 %v777_v1, %v593_v3  ;;  %v595_v5 = vpop.f32.mrb[1].mxu0 }
 0x3d4   :  { %v596_v6 = vpop.f32.mrb[2].mxu0 }
 0x3d5   :  { %v599_v7 = vpack.c.bf16 %v594_v4, %v594_v4  ;;  %v597_v8 = vpop.f32.mrb[3].mxu0 }
 0x3d7   :  { %826 = vmatmul.mubr.bf16.vlgmr.msra.gmra.mrb[4].mxu0 %v599_v7 }
 0x3d8   :  { %922 = shalt.err (!%p919_p4)
}
 0x3d9   :  { %s923_s8 = scalar_lea.hbm %s1292_s11, 64 }
 0x3da   :  { %p924_p5 = scmp.ne.s32.totalorder %s1292_s11, %s923_s8  ;;  %p927_p6 = scmp.lt.u32.totalorder %s923_s8, %s1292_s11 }
 0x3dc   :  { %p929_p7 = pnand %p927_p6, %p924_p5 }
 0x3de   :  { %932 = shalt.err (!%p929_p7)
}
 0x3df   :  { %721 = dma.vmem_to_hbm [thread:$0]  %s719_s2, 64, %s1292_s11, [#allocation3]   ;;  %v791_v9 = vld [vmem:[%s1291_s10] ss:$0 sm:$0xff] }
 0x3e0   :  { %s964_s24 = smov [#allocation4]  }
 0x3e1   :  { %s728_s25 = sshll.u32 %s964_s24, 4  ;;  %s729_s25 = int_to_ptr.vmem [resolvable:$true] %s728_s25 }
 0x3e2   :  { %s933_s26 = scalar_lea.vmem %s729_s25, 32  ;;  %p938_p9 = scmp.lt.s32.totalorder %s729_s25, %s729_s25 }
 0x3e3   :  { %p934_p8 = scmp.ne.s32.totalorder %s729_s25, %s933_s26  ;;  %p939_p10 = scmp.lt.s32.totalorder %s933_s26, %s933_s26 }
 0x3e5   :  { %p940_p11 = por %p939_p10, %p938_p9 }
 0x3e7   :  { %p941_p12 = pnand %p940_p11, %p934_p8 }
 0x4aa   :  { %v705_v10 = vpop.f32.mrb[4].mxu0 }
 0x4ab   :  { %v706_v11 = vadd.f32 %v791_v9, %v705_v10  ;;  %v827_v12 = vpop.f32.mrb[5].mxu0 }
 0x4ac   :  { %v708_v13 = vpop.f32.mrb[6].mxu0 }
 0x4ad   :  { %711 = vst [vmem:[#allocation4] sm:$0x3] %v706_v11  ;;  %v828_v14 = vpop.f32.mrb[7].mxu0 }
 0x4ae   :  { %944 = shalt.err (!%p941_p12)
}
 0x4af   :  { %s945_s10 = scalar_lea.hbm %s1293_s12, 32 }
 0x4b0   :  { %p946_p13 = scmp.ne.s32.totalorder %s1293_s12, %s945_s10  ;;  %p949_p0 = scmp.lt.u32.totalorder %s945_s10, %s1293_s12 }
 0x4b2   :  { %p951_p1 = pnand %p949_p0, %p946_p13 }
 0x4b4   :  { %954 = shalt.err (!%p951_p1)
}
 0x4b5   :  { %731 = dma.vmem_to_hbm [thread:$0]  %s729_s25, 32, %s1293_s12, [#allocation5]  }
 0x4b6   :  { %955 = dma.done.wait [#allocation3], 64  }
 0x4b7   :  { %956 = vsyncadd [#allocation3], 4294967232 }
 0x4b8   :  { %957 = dma.done.wait [#allocation5], 32  }
 0x4b9   :  { %958 = vsyncadd [#allocation5], 4294967264 }
 0x4ba   :  { %738 = vsyncpa [#allocation3], 1 }
 0x4bb   :  { %739 = vsyncpa [#allocation5], 1 }

</bundles_post_ra>
